<compile_context>
chip_gen: v6e
topology: v6e:2x2x1
jax: 0.10.0
libtpu: 0.0.40
codegen_flags: <defaults>
</compile_context>

<pallas_src>
import jax
import jax.numpy as jnp
from jax.experimental import pallas as pl
from jax.experimental.pallas import tpu as pltpu

D_MODEL = 64
IN_DIM = 3


def _model_kernel(x_ref, w1t_ref, b1t_ref, w23t_ref, b23t_ref, out_ref):
    x = x_ref[...]          # (3, tile_b)  -- batch on lanes
    w1t = w1t_ref[...]      # (64, 3)

    # fc_state: Linear(3, 64) + ReLU.
    # K=3 would waste an MXU pass, so do the contraction as three
    # outer-product FMAs on the VPU. Each term is a lane-replicated (64, 1)
    # weight column times a full-lane (1, tile_b) input row -> 128/128 lane
    # utilization, no per-column lane broadcast scaling with tile_b.
    h = (w1t[:, 0:1] * x[0:1, :]
         + w1t[:, 1:2] * x[1:2, :]
         + w1t[:, 2:3] * x[2:3, :]
         + b1t_ref[...])                      # (64, tile_b)
    h = jnp.maximum(h, 0.0)

    # Fused heads on the MXU: (8, 64) @ (64, tile_b). Rows 0/1 hold w2/w3,
    # rows 2..7 are zero padding (free insurance for small-M matmul lowering).
    zfull = jnp.dot(w23t_ref[...], h, preferred_element_type=jnp.float32)
    z = zfull[0:2, :] + b23t_ref[...]         # (2, tile_b)

    # Row 0 -> mu = tanh, row 1 -> std = softplus (stable log1p form, matches
    # torch.nn.Softplus). Each activation touches only its own row; the
    # stores are lane-dense.
    out_ref[0:1, :] = jnp.tanh(z[0:1, :])
    zs = z[1:2, :]
    out_ref[1:2, :] = jnp.maximum(zs, 0.0) + jnp.log1p(jnp.exp(-jnp.abs(zs)))


def prepare_params(w1, b1, w2, b2, w3, b3):
    """One-time layout prep: transpose layer 1, fuse + pad the two heads."""
    w1t = jnp.asarray(w1).T                              # (64, 3)
    b1t = jnp.asarray(b1).reshape(D_MODEL, 1)            # (64, 1)
    w23 = jnp.concatenate([w2, w3], axis=1).T            # (2, 64)
    w23t = jnp.zeros((8, D_MODEL), jnp.float32).at[0:2, :].set(w23)  # (8, 64)
    b23t = jnp.concatenate([b2, b3], axis=1).reshape(2, 1)           # (2, 1)
    return w1t, b1t, w23t, b23t


def model_forward(state, params, *, tile_b=8192):
    """state: (B, 3) f32; params from prepare_params. Returns (mu, std), each (B, 1)."""
    w1t, b1t, w23t, b23t = params
    B = state.shape[0]
    x = state.T                                          # (3, B): batch on lanes

    # Batch tile along lanes: big to amortize ~0.35 us/step overhead, multiple
    # of 128 (lane width); force >= 2 tiles for large B so v7x's second
    # TensorCore is used via the "parallel" grid axis.
    if B <= 256:
        tb = B
    else:
        tb = min(tile_b, B)
        tb = max(128, (tb // 128) * 128)
        if pl.cdiv(B, tb) < 2:
            half = -(-B // 2)
            tb = max(128, ((half + 127) // 128) * 128)
    grid = (pl.cdiv(B, tb),)

    def inv(a):
        shape = a.shape
        return pl.BlockSpec(shape, lambda i: (0,) * len(shape))

    out = pl.pallas_call(
        _model_kernel,
        out_shape=jax.ShapeDtypeStruct((2, B), jnp.float32),
        grid=grid,
        in_specs=[
            pl.BlockSpec((IN_DIM, tb), lambda i: (0, i)),
            inv(w1t), inv(b1t), inv(w23t), inv(b23t),
        ],
        out_specs=pl.BlockSpec((2, tb), lambda i: (0, i)),
        compiler_params=pltpu.CompilerParams(
            dimension_semantics=("parallel",),
        ),
    )(x, w1t, b1t, w23t, b23t)

    # Contiguous row views; reshape back to the module's (B, 1) outputs.
    mu = out[0].reshape(B, 1)
    std = out[1].reshape(B, 1)
    return mu, std


def init_params(key):
    """Deterministic init mimicking PyTorch Linear default (U[-1/sqrt(fan_in), +])."""
    k1, k2, k3, k4, k5, k6 = jax.random.split(key, 6)

    def lin(kw, kb, fan_in, fan_out):
        bound = 1.0 / (fan_in ** 0.5)
        w = jax.random.uniform(kw, (fan_in, fan_out), jnp.float32, -bound, bound)
        b = jax.random.uniform(kb, (1, fan_out), jnp.float32, -bound, bound)
        return w, b

    w1, b1 = lin(k1, k2, IN_DIM, D_MODEL)
    w2, b2 = lin(k3, k4, D_MODEL, 1)
    w3, b3 = lin(k5, k6, D_MODEL, 1)
    return w1, b1, w2, b2, w3, b3


def _reference(state, raw_params):
    w1, b1, w2, b2, w3, b3 = raw_params
    h = jnp.maximum(state @ w1 + b1, 0.0)
    return jnp.tanh(h @ w2 + b2), jax.nn.softplus(h @ w3 + b3)


if __name__ == "__main__":
    key = jax.random.PRNGKey(0)
    k_params, k_state = jax.random.split(key)

    raw_params = init_params(k_params)
    params = prepare_params(*raw_params)

    # Small batch of Pendulum observations (obs dim = 3).
    B = 8
    state = jax.random.normal(k_state, (B, IN_DIM), dtype=jnp.float32)

    mu, std = model_forward(state, params)
    jax.block_until_ready((mu, std))

    mu_ref, std_ref = _reference(state, raw_params)
    assert mu.shape == (B, 1) and std.shape == (B, 1)
    assert jnp.allclose(mu, mu_ref, atol=1e-5), "mu mismatch"
    assert jnp.allclose(std, std_ref, atol=1e-5), "std mismatch"

    # Exercise the multi-tile / partial-last-tile path once as well.
    B2 = 384
    state2 = jax.random.normal(jax.random.PRNGKey(1), (B2, IN_DIM), dtype=jnp.float32)
    mu2, std2 = model_forward(state2, params)
    jax.block_until_ready((mu2, std2))
    mu2_ref, std2_ref = _reference(state2, raw_params)
    assert jnp.allclose(mu2, mu2_ref, atol=1e-5), "mu mismatch (tiled)"
    assert jnp.allclose(std2, std2_ref, atol=1e-5), "std mismatch (tiled)"

    print("KERNEL_OK")
</pallas_src>

<mosaic_0001>
module attributes {stable_mosaic.version = 11 : i64} {
  func.func @_model_kernel(%arg0: i32, %arg1: memref<3x8xf32, #tpu.memory_space<vmem>>, %arg2: memref<64x3xf32, #tpu.memory_space<vmem>>, %arg3: memref<64x1xf32, #tpu.memory_space<vmem>>, %arg4: memref<8x64xf32, #tpu.memory_space<vmem>>, %arg5: memref<2x1xf32, #tpu.memory_space<vmem>>, %arg6: memref<2x8xf32, #tpu.memory_space<vmem>>) attributes {dimension_semantics = [#tpu.dimension_semantics<parallel>], iteration_bounds = array<i64: 1>, scalar_prefetch = 0 : i64, scratch_operands = 0 : i64, tpu.core_type = #tpu.core_type<tc>, window_params = [{transform_indices = @transform_0, window_bounds = array<i64: 3, 8>}, {pipeline_mode = #tpu.pipeline_mode<synchronous>, transform_indices = @transform_1, window_bounds = array<i64: 64, 3>}, {pipeline_mode = #tpu.pipeline_mode<synchronous>, transform_indices = @transform_2, window_bounds = array<i64: 64, 1>}, {pipeline_mode = #tpu.pipeline_mode<synchronous>, transform_indices = @transform_3, window_bounds = array<i64: 8, 64>}, {pipeline_mode = #tpu.pipeline_mode<synchronous>, transform_indices = @transform_4, window_bounds = array<i64: 2, 1>}, {transform_indices = @transform_5, window_bounds = array<i64: 2, 8>}]} {
    %c0 = arith.constant 0 : index
    %c0_0 = arith.constant 0 : index
    %0 = vector.load %arg1[%c0, %c0_0] : memref<3x8xf32, #tpu.memory_space<vmem>>, vector<3x8xf32>
    %c0_1 = arith.constant 0 : index
    %c0_2 = arith.constant 0 : index
    %1 = vector.load %arg2[%c0_1, %c0_2] : memref<64x3xf32, #tpu.memory_space<vmem>>, vector<64x3xf32>
    %2 = vector.extract_strided_slice %1 {offsets = [0, 0], sizes = [64, 1], strides = [1, 1]} : vector<64x3xf32> to vector<64x1xf32>
    %3 = vector.extract_strided_slice %0 {offsets = [0, 0], sizes = [1, 8], strides = [1, 1]} : vector<3x8xf32> to vector<1x8xf32>
    %4 = vector.broadcast %2 : vector<64x1xf32> to vector<64x8xf32>
    %5 = vector.broadcast %3 : vector<1x8xf32> to vector<64x8xf32>
    %6 = arith.mulf %4, %5 : vector<64x8xf32>
    %7 = vector.extract_strided_slice %1 {offsets = [0, 1], sizes = [64, 1], strides = [1, 1]} : vector<64x3xf32> to vector<64x1xf32>
    %8 = vector.extract_strided_slice %0 {offsets = [1, 0], sizes = [1, 8], strides = [1, 1]} : vector<3x8xf32> to vector<1x8xf32>
    %9 = vector.broadcast %7 : vector<64x1xf32> to vector<64x8xf32>
    %10 = vector.broadcast %8 : vector<1x8xf32> to vector<64x8xf32>
    %11 = arith.mulf %9, %10 : vector<64x8xf32>
    %12 = arith.addf %6, %11 : vector<64x8xf32>
    %13 = vector.extract_strided_slice %1 {offsets = [0, 2], sizes = [64, 1], strides = [1, 1]} : vector<64x3xf32> to vector<64x1xf32>
    %14 = vector.extract_strided_slice %0 {offsets = [2, 0], sizes = [1, 8], strides = [1, 1]} : vector<3x8xf32> to vector<1x8xf32>
    %15 = vector.broadcast %13 : vector<64x1xf32> to vector<64x8xf32>
    %16 = vector.broadcast %14 : vector<1x8xf32> to vector<64x8xf32>
    %17 = arith.mulf %15, %16 : vector<64x8xf32>
    %18 = arith.addf %12, %17 : vector<64x8xf32>
    %c0_3 = arith.constant 0 : index
    %c0_4 = arith.constant 0 : index
    %19 = vector.load %arg3[%c0_3, %c0_4] : memref<64x1xf32, #tpu.memory_space<vmem>>, vector<64x1xf32>
    %20 = vector.broadcast %19 : vector<64x1xf32> to vector<64x8xf32>
    %21 = arith.addf %18, %20 : vector<64x8xf32>
    %cst = arith.constant 0.000000e+00 : f32
    %22 = vector.broadcast %cst : f32 to vector<64x8xf32>
    %23 = arith.maximumf %21, %22 : vector<64x8xf32>
    %c0_5 = arith.constant 0 : index
    %c0_6 = arith.constant 0 : index
    %24 = vector.load %arg4[%c0_5, %c0_6] : memref<8x64xf32, #tpu.memory_space<vmem>>, vector<8x64xf32>
    %cst_7 = arith.constant dense<0.000000e+00> : vector<8x8xf32>
    %25 = tpu.matmul %24, %23, %cst_7 {dimension_numbers = #tpu.dot_dimension_numbers<[1], [0], [0], [1], [0, 0, 1, 1], [], []>} : vector<8x64xf32>, vector<64x8xf32>, vector<8x8xf32> -> vector<8x8xf32>
    %26 = vector.extract_strided_slice %25 {offsets = [0, 0], sizes = [2, 8], strides = [1, 1]} : vector<8x8xf32> to vector<2x8xf32>
    %c0_8 = arith.constant 0 : index
    %c0_9 = arith.constant 0 : index
    %27 = vector.load %arg5[%c0_8, %c0_9] : memref<2x1xf32, #tpu.memory_space<vmem>>, vector<2x1xf32>
    %28 = vector.broadcast %27 : vector<2x1xf32> to vector<2x8xf32>
    %29 = arith.addf %26, %28 : vector<2x8xf32>
    %30 = vector.extract_strided_slice %29 {offsets = [0, 0], sizes = [1, 8], strides = [1, 1]} : vector<2x8xf32> to vector<1x8xf32>
    %31 = math.tanh %30 : vector<1x8xf32>
    %c0_10 = arith.constant 0 : index
    %c0_11 = arith.constant 0 : index
    %32 = vector.load %arg6[%c0_10, %c0_11] : memref<2x8xf32, #tpu.memory_space<vmem>>, vector<1x8xf32>
    tpu.vector_store %arg6[%c0_10, %c0_11], %31 {strides = array<i32>} : memref<2x8xf32, #tpu.memory_space<vmem>>, vector<1x8xf32>,
    %33 = vector.extract_strided_slice %29 {offsets = [1, 0], sizes = [1, 8], strides = [1, 1]} : vector<2x8xf32> to vector<1x8xf32>
    %cst_12 = arith.constant 0.000000e+00 : f32
    %34 = vector.broadcast %cst_12 : f32 to vector<1x8xf32>
    %35 = arith.maximumf %33, %34 : vector<1x8xf32>
    %36 = math.absf %33 : vector<1x8xf32>
    %cst_13 = arith.constant 0.000000e+00 : f32
    %37 = vector.broadcast %cst_13 : f32 to vector<1x8xf32>
    %38 = arith.subf %37, %36 : vector<1x8xf32>
    %39 = math.exp %38 : vector<1x8xf32>
    %40 = math.log1p %39 : vector<1x8xf32>
    %41 = arith.addf %35, %40 : vector<1x8xf32>
    %c1 = arith.constant 1 : index
    %c0_14 = arith.constant 0 : index
    %42 = vector.load %arg6[%c1, %c0_14] : memref<2x8xf32, #tpu.memory_space<vmem>>, vector<1x8xf32>
    tpu.vector_store %arg6[%c1, %c0_14], %41 {strides = array<i32>} : memref<2x8xf32, #tpu.memory_space<vmem>>, vector<1x8xf32>,
    return
  }
  func.func @transform_0(%arg0: i32) -> (i32, i32) {
    %c0_i32 = arith.constant 0 : i32
    %c0_i32_0 = arith.constant 0 : i32
    return %c0_i32, %arg0 : i32, i32
  }
  func.func @transform_1(%arg0: i32) -> (i32, i32) {
    %c0_i32 = arith.constant 0 : i32
    %c0_i32_0 = arith.constant 0 : i32
    %c0_i32_1 = arith.constant 0 : i32
    return %c0_i32, %c0_i32_0 : i32, i32
  }
  func.func @transform_2(%arg0: i32) -> (i32, i32) {
    %c0_i32 = arith.constant 0 : i32
    %c0_i32_0 = arith.constant 0 : i32
    %c0_i32_1 = arith.constant 0 : i32
    return %c0_i32, %c0_i32_0 : i32, i32
  }
  func.func @transform_3(%arg0: i32) -> (i32, i32) {
    %c0_i32 = arith.constant 0 : i32
    %c0_i32_0 = arith.constant 0 : i32
    %c0_i32_1 = arith.constant 0 : i32
    return %c0_i32, %c0_i32_0 : i32, i32
  }
  func.func @transform_4(%arg0: i32) -> (i32, i32) {
    %c0_i32 = arith.constant 0 : i32
    %c0_i32_0 = arith.constant 0 : i32
    %c0_i32_1 = arith.constant 0 : i32
    return %c0_i32, %c0_i32_0 : i32, i32
  }
  func.func @transform_5(%arg0: i32) -> (i32, i32) {
    %c0_i32 = arith.constant 0 : i32
    %c0_i32_0 = arith.constant 0 : i32
    return %c0_i32, %arg0 : i32, i32
  }
}

</mosaic_0001>

<bundles_post_ra>
// kernel: tpu_custom_call.1
= control target key start
LH: loop header
LB: loop body
LE: loop exit
PB: predicated region body
PF: predicated region fallthrough
CT: control target
= control target key end

     0   :  { %v449_v2 = vmov 2   ;;  %v450_v3 = vmov 0   ;;  %v451_v5 = vmov 1   ;;  %s601_s0 = inlined_call_operand.vmem [shape: f32[3,8], index: 0, kind: input, shape index: {}]   ;;  %s602_s1 = inlined_call_operand.vmem [shape: f32[64,3], index: 1, kind: input, shape index: {}]   ;;  %s603_s2 = inlined_call_operand.vmem [shape: f32[64,1], index: 2, kind: input, shape index: {}]   ;;  %s604_s3 = inlined_call_operand.vmem [shape: f32[8,64], index: 3, kind: input, shape index: {}]   ;;  %s605_s4 = inlined_call_operand.vmem [shape: f32[2,1], index: 4, kind: input, shape index: {}]   ;;  %s606_s5 = inlined_call_operand.hbm [shape: f32[2,8], index: 5, kind: output, shape index: {}]  }
   0x1   :  { %v28_v0 = vld [vmem:[%s602_s1 + $0x30] sm:$0xff]  ;;  %v27_v1 = vld [vmem:[%s602_s1 + $0x28] sm:$0xff]  ;;  %407 = vset.pattern.permute.xlu0 %v449_v2  ;;  %401 = vset.pattern.permute.xlu1 %v450_v3  ;;  %v29_v4 = vld [vmem:[%s602_s1 + $0x38] sm:$0xff] }
   0x2   :  { %62 = vperm.xlu1 %401, %v28_v0   ;;  %155 = vperm.xlu0 %407, %v27_v1  }
   0x6   :  { %402 = vset.pattern.permute.xlu1 %v451_v5  ;;  %408 = vset.pattern.permute.xlu0 %v451_v5 }
   0x7   :  { %10 = vsyncpa [#allocation3], 0  ;;  %107 = vperm.xlu1 %402, %v28_v0   ;;  %111 = vperm.xlu0 %408, %v29_v4   ;;  %v25_v6 = vld [vmem:[%s602_s1 + $0x18] sm:$0xff]  ;;  %v23_v7 = vld [vmem:[%s602_s1 + $0x8] sm:$0xff]  ;;  %v452_v11 = vmov 0.0   ;;  %vm453_vm0 = vmmov 0   ;;  %v70_v25 = vlaneseq }
   0x8   :  { %v26_v8 = vld [vmem:[%s602_s1 + $0x20] sm:$0xff]  ;;  %v193_v9 = vld [vmem:[%s603_s2 + $0x38] sm:$0xff]  ;;  %v24_v10 = vld [vmem:[%s602_s1 + $0x10] sm:$0xff]  ;;  %376 = vmatprep.subr.mxu0 %v452_v11  ;;  %392 = vmatprep.mubr.msk.f32.mxu0 %vm453_vm0, %v452_v11  ;;  %vm251_vm1 = vcmask 523264   ;;  %vm333_vm2 = vcmask 57344   ;;  %vm350_vm4 = vcmask 58369  }
   0x9   :  { %v191_v12 = vld [vmem:[%s603_s2 + $0x28] sm:$0xff]  ;;  %v22_v13 = vld [vmem:[%s602_s1] sm:$0xff]  ;;  %v189_v14 = vld [vmem:[%s603_s2 + $0x18] sm:$0xff]  ;;  %v71_v28 = vshrl.u32 %v70_v25, 7 }
   0xa   :  { %v192_v15 = vld [vmem:[%s603_s2 + $0x30] sm:$0xff]  ;;  %v186_v17 = vld [vmem:[%s603_s2] sm:$0xff]  ;;  %v187_v19 = vld [vmem:[%s603_s2 + $0x8] sm:$0xff] }
   0xb   :  { %403 = vset.pattern.permute.xlu1 %v449_v2  ;;  %95 = vperm.xlu0 %408, %v25_v6   ;;  %v188_v16 = vld [vmem:[%s603_s2 + $0x10] sm:$0xff]  ;;  %v190_v18 = vld [vmem:[%s603_s2 + $0x20] sm:$0xff]  ;;  %v72_v30 = vsub.s32 0, %v71_v28  ;;  %v116_v31 = vsub.s32 1, %v71_v28  ;;  %v168_v36 = vsub.s32 2, %v71_v28 }
   0xc   :  { %163 = vperm.xlu1 %403, %v29_v4   ;;  %v325_v20 = vld [vmem:[%s605_s4] sm:$0x3] }
   0xd   :  { %v21_v33 = vld [vmem:[%s601_s0] sm:$0x7] }
   0xe   :  { %v557_v35 = vrot.slane %v21_v33, %v72_v30  ;;  %v559_v37 = vrot.slane %v21_v33, %v116_v31  ;;  %v563_v41 = vrot.slane %v21_v33, %v168_v36 }
   0xf   :  { %87 = vperm.xlu0 %408, %v23_v7  }
  0x10   :  { %404 = vset.pattern.permute.xlu1 %v451_v5 }
  0x11   :  { %103 = vperm.xlu1 %404, %v27_v1  }
  0x13   :  { %415 = vset.pattern.permute.xlu0 %v450_v3 }
  0x14   :  { %67 = vperm.xlu0 %415, %v29_v4  }
  0x15   :  { %405 = vset.pattern.permute.xlu1 %v449_v2 }
  0x16   :  { %159 = vperm.xlu1 %405, %v28_v0  }
  0x18   :  { %57 = vperm.xlu0 %415, %v27_v1  }
  0x1a   :  { %406 = vset.pattern.permute.xlu1 %v451_v5 }
  0x1b   :  { %99 = vperm.xlu1 %406, %v26_v8  }
  0x1c   :  { %52 = vperm.xlu0 %415, %v26_v8  }
  0x1f   :  { %409 = vset.pattern.permute.xlu1 %v450_v3 }
  0x20   :  { %231 = vperm.xlu1 %409, %v193_v9   ;;  %42 = vperm.xlu0 %415, %v24_v10  }
  0x24   :  { %47 = vperm.xlu1 %409, %v25_v6   ;;  %221 = vperm.xlu0 %415, %v191_v12  }
  0x28   :  { %410 = vset.pattern.permute.xlu1 %v449_v2  ;;  %32 = vperm.xlu0 %415, %v22_v13  }
  0x29   :  { %151 = vperm.xlu1 %410, %v26_v8  }
  0x2c   :  { %211 = vperm.xlu0 %415, %v189_v14  }
  0x2d   :  { %411 = vset.pattern.permute.xlu1 %v450_v3 }
  0x2e   :  { %226 = vperm.xlu1 %411, %v192_v15  }
  0x30   :  { %206 = vperm.xlu0 %415, %v188_v16  }
  0x32   :  { %412 = vset.pattern.permute.xlu1 %v451_v5 }
  0x33   :  { %91 = vperm.xlu1 %412, %v24_v10  }
  0x34   :  { %196 = vperm.xlu0 %415, %v186_v17  }
  0x37   :  { %413 = vset.pattern.permute.xlu1 %v449_v2 }
  0x38   :  { %147 = vperm.xlu1 %413, %v25_v6  }
  0x3c   :  { %414 = vset.pattern.permute.xlu1 %v450_v3 }
  0x3d   :  { %37 = vperm.xlu1 %414, %v23_v7  }
  0x41   :  { %416 = vset.pattern.permute.xlu1 %v449_v2 }
  0x42   :  { %143 = vperm.xlu1 %416, %v24_v10  }
  0x46   :  { %417 = vset.pattern.permute.xlu1 %v450_v3 }
  0x47   :  { %216 = vperm.xlu1 %417, %v190_v18  }
  0x4b   :  { %418 = vset.pattern.permute.xlu1 %v451_v5 }
  0x4c   :  { %83 = vperm.xlu1 %418, %v22_v13  }
  0x50   :  { %419 = vset.pattern.permute.xlu1 %v449_v2 }
  0x51   :  { %139 = vperm.xlu1 %419, %v23_v7  }
  0x55   :  { %135 = vperm.xlu1 %419, %v22_v13  }
  0x59   :  { %420 = vset.pattern.permute.xlu1 %v450_v3 }
  0x5a   :  { %201 = vperm.xlu1 %420, %v187_v19  }
  0x5e   :  { %328 = vperm.xlu1 %420, %v325_v20  }
  0x7d   :  { %v63_v21 = vpop.permute.xlu1 %62  ;;  %v156_v22 = vpop.permute.xlu0 %155 }
  0x7e   :  { %v80_v56 = vmul.f32 %v557_v35, %v63_v21  ;;  %v175_v57 = vmul.f32 %v563_v41, %v156_v22 }
  0x82   :  { %v108_v23 = vpop.permute.xlu1 %107  ;;  %v112_v24 = vpop.permute.xlu0 %111 }
  0x83   :  { %v125_v39 = vmul.f32 %v559_v37, %v112_v24  ;;  %v124_v54 = vmul.f32 %v559_v37, %v108_v23 }
  0x85   :  { %v132_v61 = vadd.f32 %v124_v54, %v80_v56 }
  0x86   :  { %v96_v26 = vpop.permute.xlu0 %95 }
  0x87   :  { %v164_v27 = vpop.permute.xlu1 %163  ;;  %v121_v10 = vmul.f32 %v559_v37, %v96_v26 }
  0x88   :  { %v177_v45 = vmul.f32 %v563_v41, %v164_v27 }
  0x8a   :  { %v552_v29 = vpop.permute.xlu0 %87 }
  0x8c   :  { %v104_v32 = vpop.permute.xlu1 %103 }
  0x8d   :  { %v123_v55 = vmul.f32 %v559_v37, %v104_v32 }
  0x8f   :  { %v68_v34 = vpop.permute.xlu0 %67 }
  0x90   :  { %v81_v40 = vmul.f32 %v557_v35, %v68_v34 }
  0x91   :  { %v160_v38 = vpop.permute.xlu1 %159 }
  0x92   :  { %v133_v43 = vadd.f32 %v125_v39, %v81_v40  ;;  %v176_v58 = vmul.f32 %v563_v41, %v160_v38 }
  0x93   :  { %v58_v42 = vpop.permute.xlu0 %57 }
  0x94   :  { %v185_v46 = vadd.f32 %v177_v45, %v133_v43  ;;  %v79_v52 = vmul.f32 %v557_v35, %v58_v42  ;;  %v184_v0 = vadd.f32 %v176_v58, %v132_v61  ;;  %v119_v45 = vmul.f32 %v559_v37, %v552_v29  ;;  %v250_v29 = vld [vmem:[%s604_s3] sm:$0xff]  ;;  %s454_s3 = smov [#allocation2]  }
  0x95   :  { %s358_s27 = sshll.u32 %s454_s3, 4  ;;  %s359_s27 = int_to_ptr.vmem [resolvable:$true] %s358_s27 }
  0x96   :  { %v100_v44 = vpop.permute.xlu1 %99  ;;  %v131_v59 = vadd.f32 %v123_v55, %v79_v52  ;;  %s427_s28 = scalar_lea.vmem %s359_s27, 32  ;;  %p432_p1 = scmp.lt.s32.totalorder %s359_s27, %s359_s27 }
  0x97   :  { %v53_v47 = vpop.permute.xlu0 %52  ;;  %v122_v13 = vmul.f32 %v559_v37, %v100_v44  ;;  %p428_p0 = scmp.ne.s32.totalorder %s359_s27, %s427_s28  ;;  %p433_p2 = scmp.lt.s32.totalorder %s427_s28, %s427_s28 }
  0x98   :  { %v183_v63 = vadd.f32 %v175_v57, %v131_v59  ;;  %v78_v14 = vmul.f32 %v557_v35, %v53_v47 }
  0x99   :  { %p434_p3 = por %p433_p2, %p432_p1 }
  0x9a   :  { %v130_v23 = vadd.f32 %v122_v13, %v78_v14 }
  0x9b   :  { %v232_v48 = vpop.permute.xlu1 %231  ;;  %v43_v53 = vpop.permute.xlu0 %42  ;;  %p435_p4 = pnand %p434_p3, %p428_p0 }
  0x9c   :  { %v241_v49 = vadd.f32 %v232_v48, %v185_v46  ;;  %v76_v15 = vmul.f32 %v557_v35, %v43_v53 }
  0x9e   :  { %v249_v50 = vmax.f32 %v241_v49, 0.0 }
  0x9f   :  { %v48_v51 = vpop.permute.xlu1 %47  ;;  %v222_v62 = vpop.permute.xlu0 %221 }
  0xa0   :  { %377 = vmatpush3.msra.mxu0 %v249_v50  ;;  %v239_v2 = vadd.f32 %v222_v62, %v183_v63  ;;  %v77_v12 = vmul.f32 %v557_v35, %v48_v51 }
  0xa1   :  { %378 = vmatprep.subr.mxu0 %v452_v11 }
  0xa2   :  { %v247_v5 = vmax.f32 %v239_v2, 0.0  ;;  %v129_v18 = vadd.f32 %v121_v10, %v77_v12 }
  0xa3   :  { %v33_v8 = vpop.permute.xlu0 %32 }
  0xa4   :  { %v152_v60 = vpop.permute.xlu1 %151  ;;  %v74_v44 = vmul.f32 %v557_v35, %v33_v8 }
  0xa5   :  { %v174_v19 = vmul.f32 %v563_v41, %v152_v60 }
  0xa7   :  { %v212_v21 = vpop.permute.xlu0 %211  ;;  %v182_v27 = vadd.f32 %v174_v19, %v130_v23 }
  0xa9   :  { %v227_v1 = vpop.permute.xlu1 %226 }
  0xaa   :  { %v240_v3 = vadd.f32 %v227_v1, %v184_v0 }
  0xab   :  { %v207_v32 = vpop.permute.xlu0 %206 }
  0xac   :  { %v248_v4 = vmax.f32 %v240_v3, 0.0 }
  0xae   :  { %v92_v6 = vpop.permute.xlu1 %91  ;;  %379 = vmatpush3.msra.mxu0 %v248_v4 }
  0xaf   :  { %380 = vmatprep.subr.mxu0 %v452_v11  ;;  %v120_v16 = vmul.f32 %v559_v37, %v92_v6  ;;  %v197_v53 = vpop.permute.xlu0 %196 }
  0xb0   :  { %381 = vmatpush3.msra.mxu0 %v247_v5 }
  0xb1   :  { %382 = vmatprep.subr.mxu0 %v452_v11  ;;  %v128_v24 = vadd.f32 %v120_v16, %v76_v15 }
  0xb3   :  { %v148_v7 = vpop.permute.xlu1 %147 }
  0xb4   :  { %v173_v17 = vmul.f32 %v563_v41, %v148_v7 }
  0xb6   :  { %v181_v25 = vadd.f32 %v173_v17, %v129_v18 }
  0xb8   :  { %v38_v9 = vpop.permute.xlu1 %37  ;;  %v237_v31 = vadd.f32 %v212_v21, %v181_v25 }
  0xb9   :  { %v75_v43 = vmul.f32 %v557_v35, %v38_v9 }
  0xba   :  { %v245_v38 = vmax.f32 %v237_v31, 0.0 }
  0xbb   :  { %v127_v50 = vadd.f32 %v119_v45, %v75_v43 }
  0xbd   :  { %v144_v20 = vpop.permute.xlu1 %143 }
  0xbe   :  { %v172_v22 = vmul.f32 %v563_v41, %v144_v20 }
  0xc0   :  { %v180_v26 = vadd.f32 %v172_v22, %v128_v24 }
  0xc2   :  { %v217_v28 = vpop.permute.xlu1 %216  ;;  %v236_v34 = vadd.f32 %v207_v32, %v180_v26 }
  0xc3   :  { %v238_v30 = vadd.f32 %v217_v28, %v182_v27 }
  0xc4   :  { %v244_v39 = vmax.f32 %v236_v34, 0.0 }
  0xc5   :  { %v246_v33 = vmax.f32 %v238_v30, 0.0 }
  0xc7   :  { %v84_v36 = vpop.permute.xlu1 %83  ;;  %383 = vmatpush3.msra.mxu0 %v246_v33 }
  0xc8   :  { %384 = vmatprep.subr.mxu0 %v452_v11  ;;  %v118_v42 = vmul.f32 %v559_v37, %v84_v36 }
  0xc9   :  { %385 = vmatpush3.msra.mxu0 %v245_v38 }
  0xca   :  { %386 = vmatprep.subr.mxu0 %v452_v11  ;;  %v126_v48 = vadd.f32 %v118_v42, %v74_v44 }
  0xcb   :  { %387 = vmatpush3.msra.mxu0 %v244_v39 }
  0xcc   :  { %v140_v40 = vpop.permute.xlu1 %139  ;;  %388 = vmatprep.subr.mxu0 %v452_v11 }
  0xcd   :  { %v171_v46 = vmul.f32 %v563_v41, %v140_v40 }
  0xcf   :  { %v179_v52 = vadd.f32 %v171_v46, %v127_v50 }
  0xd0   :  { %v136_v47 = vpop.permute.xlu1 %135 }
  0xd1   :  { %v170_v49 = vmul.f32 %v563_v41, %v136_v47 }
  0xd3   :  { %v178_v51 = vadd.f32 %v170_v49, %v126_v48 }
  0xd5   :  { %v202_v54 = vpop.permute.xlu1 %201  ;;  %v234_v56 = vadd.f32 %v197_v53, %v178_v51 }
  0xd6   :  { %v235_v55 = vadd.f32 %v202_v54, %v179_v52 }
  0xd7   :  { %v242_v58 = vmax.f32 %v234_v56, 0.0 }
  0xd8   :  { %v243_v57 = vmax.f32 %v235_v55, 0.0 }
  0xd9   :  { %v329_v35 = vpop.permute.xlu1 %328 }
  0xda   :  { %389 = vmatpush3.msra.mxu0 %v243_v57 }
  0xdb   :  { %390 = vmatprep.subr.mxu0 %v452_v11 }
  0xdc   :  { %391 = vmatpush3.msra.mxu0 %v242_v58 }
  0xdd   :  { %393 = vmatmul.mubr.msk.f32.vlgmr.msra.gmra.mxu0 %vm251_vm1, %v250_v29 }
 0x19d   :  { %v321_v37 = vpop.f32.mrf.mxu0 }
 0x19e   :  { %v331_v41 = vadd.f32 %v329_v35, %v321_v37 }
 0x19f   :  { %v394_v59 = vpop.f32.mrf.mxu0 }
 0x1a0   :  { %421 = vtanh.f32 %v331_v41  ;;  %v336_v60 = vand.u32 2147483647, %v331_v41  ;;  %v335_v7 = vmax.f32 %v331_v41, 0.0 }
 0x1a2   :  { %v337_v61 = vsub.f32 0.0, %v336_v60 }
 0x1a4   :  { %v338_v62 = vmul.f32 1.442695, %v337_v61 }
 0x1a6   :  { %423 = vpow2.f32 %v338_v62 }
 0x1ad   :  { %v422_v63 = vpop.eup %421 }
 0x1ae   :  { %334 = vst.msk [vmem:[#allocation2] sm:$0x1] %vm333_vm2, %v422_v63 }
 0x1b3   :  { %v424_v0 = vpop.eup %423 }
 0x1b4   :  { %v340_v1 = vadd.f32 1.0, %v424_v0  ;;  %v343_v2 = vmul.f32 -0.5, %v424_v0  ;;  %v346_v11 = vand.u32 2147483647, %v424_v0 }
 0x1b6   :  { %425 = vlog2.f32 %v340_v1  ;;  %v344_v3 = vadd.f32 1.0, %v343_v2  ;;  %vm347_vm3 = vcmp.lt.f32.partialorder %v346_v11, 0.0004427343 }
 0x1b8   :  { %v345_v6 = vmul.f32 %v424_v0, %v344_v3 }
 0x1c3   :  { %v426_v4 = vpop.eup %425 }
 0x1c4   :  { %v342_v5 = vmul.f32 0.6931472, %v426_v4 }
 0x1c6   :  { %v348_v8 = vsel %vm347_vm3, %v345_v6, %v342_v5 }
 0x1c7   :  { %v349_v9 = vadd.f32 %v348_v8, %v335_v7 }
 0x1c9   :  { %351 = vst.msk [vmem:[#allocation2] sm:$0x2] %vm350_vm4, %v349_v9 }
 0x1ca   :  { %438 = shalt.err (!%p435_p4)
}
 0x1cb   :  { %361 = dma.vmem_to_hbm [thread:$0]  %s359_s27, 32, %s606_s5, [#allocation3]  }
 0x1cc   :  { %447 = dma.done.wait [#allocation3], 32  }
 0x1cd   :  { %448 = vsyncadd [#allocation3], 4294967264 }
 0x1ce   :  { %365 = vsyncpa [#allocation3], 1 }

</bundles_post_ra>
